<compile_context>
chip_gen: v7x
topology: tpu7x:2x2x1
jax: 0.10.0
libtpu: 0.0.40
codegen_flags: <defaults>
</compile_context>

<pallas_src>
import functools

import jax
import jax.numpy as jnp
from jax.experimental import pallas as pl
from jax.experimental.pallas import tpu as pltpu

EPS = 1000000.0   # from LayerNorm(features, eps=1000000.0)
DROP_P = 0.1      # from SublayerConnection(size, dropout=0.1)

# VMEM budgeting: tile for the smallest generation (v7x: 64 MiB VMEM per TC).
_VMEM_WORKING_SET_BUDGET = 24 * 1024 * 1024   # double-buffered tiles must fit here
_VMEM_LIMIT_BYTES = 40 * 1024 * 1024          # scoped VMEM limit handed to Mosaic
_MAX_TILE_ROWS = 1024

_COMPILER_PARAMS = pltpu.CompilerParams(
    dimension_semantics=("parallel",),        # shard row-grid across TCs on v7x
    vmem_limit_bytes=_VMEM_LIMIT_BYTES,
)


def _pick_tile_rows(n_rows, bytes_per_row):
    """Largest row tile whose double-buffered working set fits the VMEM budget.

    Returns either the full row count (single block, always a legal BlockSpec)
    or a sublane-aligned (multiple of 8) divisor of n_rows.
    """
    max_rows = max(1, _VMEM_WORKING_SET_BUDGET // (2 * bytes_per_row))
    max_rows = min(max_rows, _MAX_TILE_ROWS, n_rows)
    if n_rows <= max_rows:
        return n_rows
    start = max_rows - (max_rows % 8)
    for t in range(start, 0, -8):
        if n_rows % t == 0:
            return t
    # No aligned divisor <= budget: fall back to an untiled single-block launch.
    return n_rows


# ---------------------------------------------------------------------------
# Kernel 1: LayerNorm over the last axis (unbiased std, torch semantics)
# ---------------------------------------------------------------------------
def layernorm_kernel(x_ref, a_ref, b_ref, o_ref):
    x = x_ref[...].astype(jnp.float32)                   # (tile_rows, D)
    a = a_ref[...].astype(jnp.float32)                   # (1, D), loaded/cast once
    b = b_ref[...].astype(jnp.float32)                   # (1, D)
    d = x.shape[-1]
    mean = jnp.mean(x, axis=-1, keepdims=True)
    xc = x - mean
    # torch.std(..., unbiased=True): divide by (D - 1)
    var_unbiased = jnp.sum(xc * xc, axis=-1, keepdims=True) * (1.0 / (d - 1))
    std = jnp.sqrt(var_unbiased)
    inv = 1.0 / (std + EPS)                               # one divide per row
    y = a * (xc * inv) + b                                # broadcast multiply
    o_ref[...] = y.astype(o_ref.dtype)


def layernorm_pallas(x2d, a2, b2):
    R, D = x2d.shape
    itemsize = x2d.dtype.itemsize
    tile_rows = _pick_tile_rows(R, 2 * D * itemsize)      # input + output streams
    row_spec = pl.BlockSpec((tile_rows, D), lambda i: (i, 0))
    param_spec = pl.BlockSpec((1, D), lambda i: (0, 0))
    return pl.pallas_call(
        layernorm_kernel,
        out_shape=jax.ShapeDtypeStruct((R, D), x2d.dtype),
        grid=(R // tile_rows,),
        in_specs=[row_spec, param_spec, param_spec],
        out_specs=row_spec,
        compiler_params=_COMPILER_PARAMS,
    )(x2d, a2.reshape(1, D), b2.reshape(1, D))


# ---------------------------------------------------------------------------
# Kernel 2: residual add + (inverted) dropout on the sublayer output
#   out = x + dropout(y)
# ---------------------------------------------------------------------------
def residual_dropout_kernel(x_ref, y_ref, bits_ref, o_ref, *, keep_threshold, scale):
    x = x_ref[...]
    y = y_ref[...]
    # drop probability = P(bits < threshold) = threshold / 2^32 (exact to 2^-32)
    keep = bits_ref[...] >= jnp.uint32(keep_threshold)
    y = jnp.where(keep, y * jnp.asarray(scale, y.dtype), jnp.zeros((), y.dtype))
    o_ref[...] = (x + y).astype(o_ref.dtype)


def residual_add_kernel(x_ref, y_ref, o_ref):
    o_ref[...] = (x_ref[...] + y_ref[...]).astype(o_ref.dtype)


def residual_dropout_pallas(x2d, y2d, dropout_bits=None, *, p=DROP_P, training=True):
    R, D = x2d.shape
    itemsize = x2d.dtype.itemsize
    use_dropout = training and p > 0.0
    if use_dropout:
        assert dropout_bits is not None and dropout_bits.shape == (R, D)
        bytes_per_row = D * (3 * itemsize + 4)            # x, y, out + uint32 bits
    else:
        bytes_per_row = D * 3 * itemsize                  # x, y, out
    tile_rows = _pick_tile_rows(R, bytes_per_row)
    row_spec = pl.BlockSpec((tile_rows, D), lambda i: (i, 0))

    if use_dropout:
        keep_threshold = int(round(p * (1 << 32)))
        kernel = functools.partial(residual_dropout_kernel,
                                   keep_threshold=keep_threshold,
                                   scale=1.0 / (1.0 - p))
        in_specs = [row_spec, row_spec, row_spec]
        args = (x2d, y2d, dropout_bits)
    else:
        kernel = residual_add_kernel
        in_specs = [row_spec, row_spec]
        args = (x2d, y2d)

    return pl.pallas_call(
        kernel,
        out_shape=jax.ShapeDtypeStruct((R, D), x2d.dtype),
        grid=(R // tile_rows,),
        in_specs=in_specs,
        out_specs=row_spec,
        compiler_params=_COMPILER_PARAMS,
    )(*args)


# ---------------------------------------------------------------------------
# SublayerConnection.forward(x, sublayer)
# ---------------------------------------------------------------------------
def sublayer_connection(x, sublayer, a2, b2, *, dropout_rng=None, p=DROP_P,
                        training=True):
    B, S, D = x.shape
    R = B * S
    x2d = x.reshape(R, D)
    normed = layernorm_pallas(x2d, a2, b2)
    # TODO(synk): `sublayer` is an arbitrary user callable, so it cannot be
    # fused into the Pallas kernels in general; when it is a simple pointwise
    # op, LayerNorm -> sublayer -> dropout+residual could be fused into one
    # pallas_call to cut HBM traffic by ~30-40%.
    y = sublayer(normed.reshape(B, S, D)).reshape(R, D)

    bits = None
    if training and p > 0.0:
        if dropout_rng is None:
            dropout_rng = jax.random.PRNGKey(0)
        # Host-side random bits: in-kernel pltpu.prng_* has no interpret/CPU
        # lowering in this environment.
        bits = jax.random.bits(dropout_rng, (R, D), dtype=jnp.uint32)

    out = residual_dropout_pallas(x2d, y, bits, p=p, training=training)
    return out.reshape(B, S, D)


if __name__ == "__main__":
    # Small shapes implied by the module: (batch, seq, hidden) with LayerNorm
    # over hidden.  hidden=128 keeps the feature axis lane-dense.
    B, S, D = 2, 8, 128

    key = jax.random.PRNGKey(0)
    kx, kdrop = jax.random.split(key)
    x = jax.random.normal(kx, (B, S, D), dtype=jnp.float32)

    # deterministic parameter init, matching nn.Parameter(torch.ones/zeros(features))
    a2 = jnp.ones((D,), jnp.float32)
    b2 = jnp.zeros((D,), jnp.float32)

    # the sublayer passed into forward(); use identity for the demo
    sublayer = lambda t: t

    # training-mode run (dropout active)
    out = sublayer_connection(x, sublayer, a2, b2, dropout_rng=kdrop, training=True)
    out = jax.block_until_ready(out)
    assert out.shape == (B, S, D) and out.dtype == x.dtype

    # eval-mode run, checked against a pure-JAX reference of the module
    out_eval = jax.block_until_ready(
        sublayer_connection(x, sublayer, a2, b2, training=False))
    mean = jnp.mean(x, axis=-1, keepdims=True)
    std = jnp.sqrt(jnp.sum((x - mean) ** 2, axis=-1, keepdims=True) / (D - 1))
    ref = x + (a2 * (x - mean) / (std + EPS) + b2)
    assert jnp.allclose(out_eval, ref, atol=1e-5, rtol=1e-5)

    print("KERNEL_OK")
</pallas_src>

<mosaic_0001>
module attributes {stable_mosaic.version = 11 : i64} {
  func.func @layernorm_kernel(%arg0: i32, %arg1: memref<16x128xf32, #tpu.memory_space<vmem>>, %arg2: memref<1x128xf32, #tpu.memory_space<vmem>>, %arg3: memref<1x128xf32, #tpu.memory_space<vmem>>, %arg4: memref<16x128xf32, #tpu.memory_space<vmem>>) attributes {dimension_semantics = [#tpu.dimension_semantics<parallel>], iteration_bounds = array<i64: 1>, scalar_prefetch = 0 : i64, scratch_operands = 0 : i64, tpu.core_type = #tpu.core_type<tc>, window_params = [{transform_indices = @transform_0, window_bounds = array<i64: 16, 128>}, {pipeline_mode = #tpu.pipeline_mode<synchronous>, transform_indices = @transform_1, window_bounds = array<i64: 1, 128>}, {pipeline_mode = #tpu.pipeline_mode<synchronous>, transform_indices = @transform_2, window_bounds = array<i64: 1, 128>}, {transform_indices = @transform_3, window_bounds = array<i64: 16, 128>}]} {
    %c0 = arith.constant 0 : index
    %c0_0 = arith.constant 0 : index
    %0 = vector.load %arg1[%c0, %c0_0] : memref<16x128xf32, #tpu.memory_space<vmem>>, vector<16x128xf32>
    %c0_1 = arith.constant 0 : index
    %c0_2 = arith.constant 0 : index
    %1 = vector.load %arg2[%c0_1, %c0_2] : memref<1x128xf32, #tpu.memory_space<vmem>>, vector<1x128xf32>
    %c0_3 = arith.constant 0 : index
    %c0_4 = arith.constant 0 : index
    %2 = vector.load %arg3[%c0_3, %c0_4] : memref<1x128xf32, #tpu.memory_space<vmem>>, vector<1x128xf32>
    %cst = arith.constant dense<0.000000e+00> : vector<16xf32>
    %3 = vector.multi_reduction <add>, %0, %cst [1] : vector<16x128xf32> to vector<16xf32>
    %4 = vector.shape_cast %3 : vector<16xf32> to vector<16x1xf32>
    %cst_5 = arith.constant 1.280000e+02 : f32
    %5 = vector.broadcast %cst_5 : f32 to vector<16x1xf32>
    %6 = arith.divf %4, %5 : vector<16x1xf32>
    %7 = vector.broadcast %6 : vector<16x1xf32> to vector<16x128xf32>
    %8 = arith.subf %0, %7 : vector<16x128xf32>
    %9 = arith.mulf %8, %8 : vector<16x128xf32>
    %cst_6 = arith.constant dense<0.000000e+00> : vector<16xf32>
    %10 = vector.multi_reduction <add>, %9, %cst_6 [1] : vector<16x128xf32> to vector<16xf32>
    %11 = vector.shape_cast %10 : vector<16xf32> to vector<16x1xf32>
    %cst_7 = arith.constant 0.00787401571 : f32
    %12 = vector.broadcast %cst_7 : f32 to vector<16x1xf32>
    %13 = arith.mulf %11, %12 : vector<16x1xf32>
    %14 = math.sqrt %13 : vector<16x1xf32>
    %cst_8 = arith.constant 1.000000e+06 : f32
    %15 = vector.broadcast %cst_8 : f32 to vector<16x1xf32>
    %16 = arith.addf %14, %15 : vector<16x1xf32>
    %cst_9 = arith.constant 1.000000e+00 : f32
    %17 = vector.broadcast %cst_9 : f32 to vector<16x1xf32>
    %18 = arith.divf %17, %16 : vector<16x1xf32>
    %19 = vector.broadcast %18 : vector<16x1xf32> to vector<16x128xf32>
    %20 = arith.mulf %8, %19 : vector<16x128xf32>
    %21 = vector.broadcast %1 : vector<1x128xf32> to vector<16x128xf32>
    %22 = arith.mulf %21, %20 : vector<16x128xf32>
    %23 = vector.broadcast %2 : vector<1x128xf32> to vector<16x128xf32>
    %24 = arith.addf %22, %23 : vector<16x128xf32>
    %c0_10 = arith.constant 0 : index
    %c0_11 = arith.constant 0 : index
    %25 = vector.load %arg4[%c0_10, %c0_11] : memref<16x128xf32, #tpu.memory_space<vmem>>, vector<16x128xf32>
    tpu.vector_store %arg4[%c0_10, %c0_11], %24 {strides = array<i32>} : memref<16x128xf32, #tpu.memory_space<vmem>>, vector<16x128xf32>,
    return
  }
  func.func @transform_0(%arg0: i32) -> (i32, i32) {
    %c0_i32 = arith.constant 0 : i32
    %c0_i32_0 = arith.constant 0 : i32
    return %arg0, %c0_i32 : i32, i32
  }
  func.func @transform_1(%arg0: i32) -> (i32, i32) {
    %c0_i32 = arith.constant 0 : i32
    %c0_i32_0 = arith.constant 0 : i32
    %c0_i32_1 = arith.constant 0 : i32
    return %c0_i32, %c0_i32_0 : i32, i32
  }
  func.func @transform_2(%arg0: i32) -> (i32, i32) {
    %c0_i32 = arith.constant 0 : i32
    %c0_i32_0 = arith.constant 0 : i32
    %c0_i32_1 = arith.constant 0 : i32
    return %c0_i32, %c0_i32_0 : i32, i32
  }
  func.func @transform_3(%arg0: i32) -> (i32, i32) {
    %c0_i32 = arith.constant 0 : i32
    %c0_i32_0 = arith.constant 0 : i32
    return %arg0, %c0_i32 : i32, i32
  }
}

</mosaic_0001>

<bundles_post_ra>
// kernel: tpu_custom_call.1
= control target key start
LH: loop header
LB: loop body
LE: loop exit
PB: predicated region body
PF: predicated region fallthrough
CT: control target
= control target key end

     0   :  { %8 = vsyncpa [#allocation3], 0  ;;  %s229_s0 = inlined_call_operand.hbm [shape: f32[16,128], index: 0, kind: input, shape index: {}]   ;;  %s230_s1 = inlined_call_operand.vmem [shape: f32[1,128], index: 1, kind: input, shape index: {}]   ;;  %s231_s2 = inlined_call_operand.vmem [shape: f32[1,128], index: 2, kind: input, shape index: {}]   ;;  %s232_s3 = inlined_call_operand.hbm [shape: f32[16,128], index: 3, kind: output, shape index: {}]  }
   0x1   :  { %9 = vsyncpa [#allocation4], 0  ;;  %s169_s12 = smov [#allocation2]   ;;  %s121_s16 = scalar_lea.hbm %s229_s0, 256 }
   0x2   :  { %s15_s13 = sshll.u32 %s169_s12, 4  ;;  %p122_p0 = scmp.ne.s32.totalorder %s229_s0, %s121_s16  ;;  %s16_s13 = int_to_ptr.vmem [resolvable:$true] %s15_s13 }
   0x3   :  { %p125_p1 = scmp.lt.u32.totalorder %s121_s16, %s229_s0 }
   0x5   :  { %p127_p2 = pnand %p125_p1, %p122_p0 }
   0x7   :  { %130 = shalt.err (!%p127_p2)
}
   0x8   :  { %s131_s21 = scalar_lea.vmem %s16_s13, 256  ;;  %p136_p4 = scmp.lt.s32.totalorder %s16_s13, %s16_s13 }
   0x9   :  { %p132_p3 = scmp.ne.s32.totalorder %s16_s13, %s131_s21  ;;  %p137_p5 = scmp.lt.s32.totalorder %s131_s21, %s131_s21 }
   0xb   :  { %p138_p6 = por %p137_p5, %p136_p4 }
   0xd   :  { %p139_p7 = pnand %p138_p6, %p132_p3 }
   0xf   :  { %142 = shalt.err (!%p139_p7)
}
  0x10   :  { %s170_s22 = smov 128   ;;  %s171_s23 = smov 8  }
  0x11   :  { %21 = dma.hbm_to_vmem [thread:$0]  %s229_s0, 256, %s16_s13, [#allocation3], %s170_s22, %s170_s22, %s171_s23  }
  0x12   :  { %165 = dma.done.wait [#allocation3], 256  }
  0x13   :  { %166 = vsyncadd [#allocation3], 4294967040  ;;  %v29_v0 = vld [vmem:[#allocation2] sm:$0xff]  ;;  %v30_v1 = vld [vmem:[#allocation2 + $0x8] sm:$0xff]  ;;  %s172_s29 = smov [#allocation5]  }
  0x14   :  { %33 = vadd.xlane.f32.xlu0 %v29_v0  ;;  %v107_v27 = vld [vmem:[%s230_s1] ss:$0 sm:$0xff]  ;;  %s95_s30 = sshll.u32 %s172_s29, 4  ;;  %s96_s30 = int_to_ptr.vmem [resolvable:$true] %s95_s30 }
  0x15   :  { %v108_v29 = vld [vmem:[%s231_s2] ss:$0 sm:$0xff]  ;;  %s143_s4 = scalar_lea.vmem %s96_s30, 256  ;;  %p148_p9 = scmp.lt.s32.totalorder %s96_s30, %s96_s30 }
  0x16   :  { %p144_p8 = scmp.ne.s32.totalorder %s96_s30, %s143_s4  ;;  %p149_p10 = scmp.lt.s32.totalorder %s143_s4, %s143_s4 }
  0x18   :  { %35 = vadd.xlane.f32.xlu0 %v30_v1  ;;  %p150_p11 = por %p149_p10, %p148_p9 }
  0x1a   :  { %p151_p12 = pnand %p150_p11, %p144_p8 }
  0xa1   :  { %v34_v2 = vpop.xlane.xlu0 %33 }
  0xa2   :  { %v38_v3 = vmul.f32 0.0078125, %v34_v2 }
  0xa4   :  { %v40_v4 = vsub.f32 %v29_v0, %v38_v3 }
  0xa5   :  { %v36_v5 = vpop.xlane.xlu0 %35 }
  0xa6   :  { %v39_v6 = vmul.f32 0.0078125, %v36_v5  ;;  %v42_v7 = vmul.f32 %v40_v4, %v40_v4 }
  0xa8   :  { %v41_v8 = vsub.f32 %v30_v1, %v39_v6  ;;  %44 = vadd.xlane.f32.xlu1 %v42_v7 }
  0xaa   :  { %v43_v9 = vmul.f32 %v41_v8, %v41_v8 }
  0xac   :  { %46 = vadd.xlane.f32.xlu1 %v43_v9 }
 0x135   :  { %v45_v10 = vpop.xlane.xlu1 %44 }
 0x136   :  { %v48_v11 = vmul.f32 0.007874016, %v45_v10 }
 0x138   :  { %113 = vrsqrt.f32 %v48_v11  ;;  %vm52_vm0 = vcmp.eq.f32.partialorder %v48_v11, inf  ;;  %v55_v16 = vand.u32 2147483648, %v48_v11  ;;  %vm54_vm1 = vcmp.eq.f32.partialorder %v48_v11, 0.0 }
 0x139   :  { %v47_v12 = vpop.xlane.xlu1 %46 }
 0x13a   :  { %v49_v13 = vmul.f32 0.007874016, %v47_v12 }
 0x13c   :  { %115 = vrsqrt.f32 %v49_v13  ;;  %vm59_vm2 = vcmp.eq.f32.partialorder %v49_v13, inf  ;;  %v62_v22 = vand.u32 2147483648, %v49_v13  ;;  %vm61_vm3 = vcmp.eq.f32.partialorder %v49_v13, 0.0 }
 0x142   :  { %v114_v14 = vpop.eup %113 }
 0x143   :  { %v51_v15 = vmul.f32 %v114_v14, %v48_v11 }
 0x145   :  { %v53_v17 = vsel %vm52_vm0, %v48_v11, %v51_v15 }
 0x146   :  { %v116_v18 = vpop.eup %115  ;;  %v56_v19 = vsel %vm54_vm1, %v55_v16, %v53_v17 }
 0x147   :  { %v58_v20 = vmul.f32 %v116_v18, %v49_v13  ;;  %v64_v21 = vadd.f32 1000000.0, %v56_v19 }
 0x149   :  { %v60_v23 = vsel %vm59_vm2, %v49_v13, %v58_v20  ;;  %117 = vrcp.f32 %v64_v21 }
 0x14a   :  { %v63_v24 = vsel %vm61_vm3, %v62_v22, %v60_v23 }
 0x14b   :  { %v65_v25 = vadd.f32 1000000.0, %v63_v24 }
 0x14d   :  { %119 = vrcp.f32 %v65_v25 }
 0x153   :  { %v118_v26 = vpop.eup %117 }
 0x154   :  { %v70_v28 = vmul.f32 %v118_v26, %v40_v4 }
 0x156   :  { %v78_v30 = vmul.f32 %v107_v27, %v70_v28 }
 0x157   :  { %v120_v31 = vpop.eup %119 }
 0x158   :  { %v71_v32 = vmul.f32 %v120_v31, %v41_v8  ;;  %v86_v33 = vadd.f32 %v108_v29, %v78_v30 }
 0x15a   :  { %v79_v34 = vmul.f32 %v107_v27, %v71_v32  ;;  %88 = vst [vmem:[#allocation5] sm:$0xff] %v86_v33 }
 0x15c   :  { %v87_v35 = vadd.f32 %v108_v29, %v79_v34 }
 0x15e   :  { %89 = vst [vmem:[#allocation5 + $0x8] sm:$0xff] %v87_v35 }
 0x15f   :  { %154 = shalt.err (!%p151_p12)
}
 0x160   :  { %s155_s5 = scalar_lea.hbm %s232_s3, 256 }
 0x161   :  { %p156_p13 = scmp.ne.s32.totalorder %s232_s3, %s155_s5  ;;  %p159_p0 = scmp.lt.u32.totalorder %s155_s5, %s232_s3 }
 0x163   :  { %p161_p1 = pnand %p159_p0, %p156_p13 }
 0x165   :  { %164 = shalt.err (!%p161_p1)
}
 0x166   :  { %101 = dma.vmem_to_hbm [thread:$0]  %s96_s30, 256, %s232_s3, [#allocation4], %s170_s22, %s170_s22, %s171_s23  }
 0x167   :  { %167 = dma.done.wait [#allocation4], 256  }
 0x168   :  { %168 = vsyncadd [#allocation4], 4294967040 }
 0x169   :  { %105 = vsyncpa [#allocation3], 1 }
 0x16a   :  { %106 = vsyncpa [#allocation4], 1 }

</bundles_post_ra>
